<compile_context>
chip_gen: v7x
topology: tpu7x:2x2x1
jax: 0.10.0
libtpu: 0.0.40
codegen_flags: <defaults>
</compile_context>

<pallas_src>
import functools

import jax
import jax.numpy as jnp
from jax import lax
from jax.experimental import pallas as pl
from jax.experimental.pallas import tpu as pltpu

LAYER_SIZES = [4, 32, 64, 128, 64, 32, 1]
LANE = 128
CHUNK = 2 * LANE      # 256-column lane sub-tile processed fully in-register
MAX_TILE = 2048       # per-grid-step batch columns (multiple of CHUNK)


def mlp_kernel(x_ref,
               w1_ref, b1_ref, w2_ref, b2_ref, w3_ref, b3_ref,
               w4_ref, b4_ref, w5_ref, b5_ref, w6_ref, b6_ref,
               o_ref):
    """Fused 6-layer MLP. Activations: (features, batch_tile); weights: (out, in) bf16."""
    # Hoist weight / bias loads out of the chunk loop (values, not refs).
    w1, w2, w3 = w1_ref[...], w2_ref[...], w3_ref[...]
    w4, w5, w6 = w4_ref[...], w5_ref[...], w6_ref[...]
    b1, b2, b3 = b1_ref[...], b2_ref[...], b3_ref[...]
    b4, b5, b6 = b4_ref[...], b5_ref[...], b6_ref[...]

    n_chunks = x_ref.shape[1] // CHUNK

    def chunk_body(c, carry):
        start = pl.multiple_of(c * CHUNK, LANE)       # aligned, unmasked slices
        h = x_ref[:, pl.ds(start, CHUNK)]             # (4, CHUNK) f32
        # bf16 MXU inputs, f32 accumulation; bias-add / ReLU in f32.
        h = jnp.dot(w1, h.astype(jnp.bfloat16), preferred_element_type=jnp.float32) + b1
        h = jnp.maximum(h, 0.0).astype(jnp.bfloat16)
        h = jnp.dot(w2, h, preferred_element_type=jnp.float32) + b2
        h = jnp.maximum(h, 0.0).astype(jnp.bfloat16)
        h = jnp.dot(w3, h, preferred_element_type=jnp.float32) + b3
        h = jnp.maximum(h, 0.0).astype(jnp.bfloat16)
        h = jnp.dot(w4, h, preferred_element_type=jnp.float32) + b4
        h = jnp.maximum(h, 0.0).astype(jnp.bfloat16)
        h = jnp.dot(w5, h, preferred_element_type=jnp.float32) + b5
        h = jnp.maximum(h, 0.0).astype(jnp.bfloat16)
        h = jnp.dot(w6, h, preferred_element_type=jnp.float32) + b6   # (1, CHUNK) f32
        o_ref[:, pl.ds(start, CHUNK)] = h             # lane-dense, unmasked store
        return carry

    # Static trip count -> fully unrolled: LLO scheduler sees the whole chain.
    lax.fori_loop(0, n_chunks, chunk_body, None, unroll=True)


def _choose_tiling(batch, max_tile=MAX_TILE):
    """Grid-first sizing: minimal padding, tile a CHUNK multiple, even steps when >1."""
    cols = max(batch, CHUNK)
    steps = pl.cdiv(cols, max_tile)
    if steps > 1 and steps % 2 == 1:
        steps += 1                      # balanced work across v7x's two TensorCores
    tile = min(max_tile, pl.cdiv(pl.cdiv(cols, steps), CHUNK) * CHUNK)
    return steps * tile, tile, steps


@functools.partial(jax.jit, static_argnames=("max_tile",))
def basic_nn_forward(x, params, *, max_tile=MAX_TILE):
    """x: (B, 4) f32 (PyTorch layout). params: [(W (out,in), b (out,))] * 6. Returns (B, 1)."""
    B, F = x.shape
    assert F == LAYER_SIZES[0]
    b_pad, tile, steps = _choose_tiling(B, max_tile)

    # Feature-major / batch-in-lanes, zero-padded along batch. Padded columns are
    # independent in this orientation and sliced away at the end. Under jit this
    # pad/transpose fuses with the pallas_call's producer instead of extra dispatches.
    xt = jnp.zeros((F, b_pad), jnp.float32).at[:, :B].set(x.T.astype(jnp.float32))

    in_specs = [pl.BlockSpec((F, tile), lambda i: (0, i))]
    flat_params = []
    for (w, b) in params:
        out_dim, in_dim = w.shape
        # Constant index maps: weights/biases are VMEM-resident, no per-step re-DMA.
        in_specs.append(pl.BlockSpec((out_dim, in_dim), lambda i: (0, 0)))
        in_specs.append(pl.BlockSpec((out_dim, 1), lambda i: (0, 0)))
        flat_params += [w.astype(jnp.bfloat16), b.reshape(out_dim, 1).astype(jnp.float32)]

    out_specs = pl.BlockSpec((1, tile), lambda i: (0, i))

    flops_per_col = 2 * sum(a * b for a, b in zip(LAYER_SIZES[:-1], LAYER_SIZES[1:]))
    n_param_elems = sum(a * b + b for a, b in zip(LAYER_SIZES[:-1], LAYER_SIZES[1:]))
    cost = pl.CostEstimate(    # advisory only; ignores spill / lane-padded weight storage
        flops=flops_per_col * b_pad,
        transcendentals=0,
        bytes_accessed=4 * b_pad * (LAYER_SIZES[0] + LAYER_SIZES[-1]) + 2 * n_param_elems,
    )

    out_t = pl.pallas_call(
        mlp_kernel,
        out_shape=jax.ShapeDtypeStruct((1, b_pad), jnp.float32),
        grid_spec=pltpu.PrefetchScalarGridSpec(
            num_scalar_prefetch=0,
            grid=(steps,),
            in_specs=in_specs,
            out_specs=out_specs,
        ),
        compiler_params=pltpu.CompilerParams(
            dimension_semantics=("parallel",)),
        cost_estimate=cost,
    )(xt, *flat_params)

    return out_t[:, :B].T  # (B, 1), PyTorch output layout


def init_params(key):
    """Deterministic init with PyTorch Linear shapes: W (out, in), b (out,)."""
    params = []
    for fan_in, fan_out in zip(LAYER_SIZES[:-1], LAYER_SIZES[1:]):
        key, kw, kb = jax.random.split(key, 3)
        bound = 1.0 / float(fan_in) ** 0.5
        w = jax.random.uniform(kw, (fan_out, fan_in), jnp.float32, -bound, bound)
        b = jax.random.uniform(kb, (fan_out,), jnp.float32, -bound, bound)
        params.append((w, b))
    return params


def reference_forward(x, params):
    """Pure-JAX f32 reference matching the PyTorch module: Linear + ReLU stack."""
    h = x.astype(jnp.float32)
    n = len(params)
    for i, (w, b) in enumerate(params):
        h = h @ w.T + b
        if i < n - 1:
            h = jnp.maximum(h, 0.0)
    return h


if __name__ == "__main__":
    key = jax.random.PRNGKey(0)
    kx, kp = jax.random.split(key)

    B = 16  # small example batch; wrapper pads to one 256-wide lane tile internally
    x = jax.random.normal(kx, (B, LAYER_SIZES[0]), jnp.float32)
    params = init_params(kp)

    out = jax.block_until_ready(basic_nn_forward(x, params))
    ref = reference_forward(x, params)

    assert out.shape == (B, 1)
    # bf16 MXU inputs (f32 accumulation) vs. f32 reference: bf16-level tolerance.
    assert jnp.allclose(out, ref, atol=3e-2, rtol=3e-2), "mismatch vs. reference"

    print("KERNEL_OK")
</pallas_src>

<mosaic_0001>
module attributes {stable_mosaic.version = 11 : i64} {
  func.func @mlp_kernel(%arg0: i32, %arg1: memref<4x256xf32, #tpu.memory_space<vmem>>, %arg2: memref<32x4xbf16, #tpu.memory_space<vmem>>, %arg3: memref<32x1xf32, #tpu.memory_space<vmem>>, %arg4: memref<64x32xbf16, #tpu.memory_space<vmem>>, %arg5: memref<64x1xf32, #tpu.memory_space<vmem>>, %arg6: memref<128x64xbf16, #tpu.memory_space<vmem>>, %arg7: memref<128x1xf32, #tpu.memory_space<vmem>>, %arg8: memref<64x128xbf16, #tpu.memory_space<vmem>>, %arg9: memref<64x1xf32, #tpu.memory_space<vmem>>, %arg10: memref<32x64xbf16, #tpu.memory_space<vmem>>, %arg11: memref<32x1xf32, #tpu.memory_space<vmem>>, %arg12: memref<1x32xbf16, #tpu.memory_space<vmem>>, %arg13: memref<1x1xf32, #tpu.memory_space<vmem>>, %arg14: memref<1x256xf32, #tpu.memory_space<vmem>>) attributes {dimension_semantics = [#tpu.dimension_semantics<parallel>], iteration_bounds = array<i64: 1>, scalar_prefetch = 0 : i64, scratch_operands = 0 : i64, tpu.core_type = #tpu.core_type<tc>, window_params = [{transform_indices = @transform_0, window_bounds = array<i64: 4, 256>}, {pipeline_mode = #tpu.pipeline_mode<synchronous>, transform_indices = @transform_1, window_bounds = array<i64: 32, 4>}, {pipeline_mode = #tpu.pipeline_mode<synchronous>, transform_indices = @transform_2, window_bounds = array<i64: 32, 1>}, {pipeline_mode = #tpu.pipeline_mode<synchronous>, transform_indices = @transform_3, window_bounds = array<i64: 64, 32>}, {pipeline_mode = #tpu.pipeline_mode<synchronous>, transform_indices = @transform_4, window_bounds = array<i64: 64, 1>}, {pipeline_mode = #tpu.pipeline_mode<synchronous>, transform_indices = @transform_5, window_bounds = array<i64: 128, 64>}, {pipeline_mode = #tpu.pipeline_mode<synchronous>, transform_indices = @transform_6, window_bounds = array<i64: 128, 1>}, {pipeline_mode = #tpu.pipeline_mode<synchronous>, transform_indices = @transform_7, window_bounds = array<i64: 64, 128>}, {pipeline_mode = #tpu.pipeline_mode<synchronous>, transform_indices = @transform_8, window_bounds = array<i64: 64, 1>}, {pipeline_mode = #tpu.pipeline_mode<synchronous>, transform_indices = @transform_9, window_bounds = array<i64: 32, 64>}, {pipeline_mode = #tpu.pipeline_mode<synchronous>, transform_indices = @transform_10, window_bounds = array<i64: 32, 1>}, {pipeline_mode = #tpu.pipeline_mode<synchronous>, transform_indices = @transform_11, window_bounds = array<i64: 1, 32>}, {pipeline_mode = #tpu.pipeline_mode<synchronous>, transform_indices = @transform_12, window_bounds = array<i64: 1, 1>}, {transform_indices = @transform_13, window_bounds = array<i64: 1, 256>}]} {
    %c0 = arith.constant 0 : index
    %c0_0 = arith.constant 0 : index
    %0 = vector.load %arg2[%c0, %c0_0] : memref<32x4xbf16, #tpu.memory_space<vmem>>, vector<32x4xbf16>
    %c0_1 = arith.constant 0 : index
    %c0_2 = arith.constant 0 : index
    %1 = vector.load %arg4[%c0_1, %c0_2] : memref<64x32xbf16, #tpu.memory_space<vmem>>, vector<64x32xbf16>
    %c0_3 = arith.constant 0 : index
    %c0_4 = arith.constant 0 : index
    %2 = vector.load %arg6[%c0_3, %c0_4] : memref<128x64xbf16, #tpu.memory_space<vmem>>, vector<128x64xbf16>
    %c0_5 = arith.constant 0 : index
    %c0_6 = arith.constant 0 : index
    %3 = vector.load %arg8[%c0_5, %c0_6] : memref<64x128xbf16, #tpu.memory_space<vmem>>, vector<64x128xbf16>
    %c0_7 = arith.constant 0 : index
    %c0_8 = arith.constant 0 : index
    %4 = vector.load %arg10[%c0_7, %c0_8] : memref<32x64xbf16, #tpu.memory_space<vmem>>, vector<32x64xbf16>
    %c0_9 = arith.constant 0 : index
    %c0_10 = arith.constant 0 : index
    %5 = vector.load %arg12[%c0_9, %c0_10] : memref<1x32xbf16, #tpu.memory_space<vmem>>, vector<1x32xbf16>
    %c0_11 = arith.constant 0 : index
    %c0_12 = arith.constant 0 : index
    %6 = vector.load %arg3[%c0_11, %c0_12] : memref<32x1xf32, #tpu.memory_space<vmem>>, vector<32x1xf32>
    %c0_13 = arith.constant 0 : index
    %c0_14 = arith.constant 0 : index
    %7 = vector.load %arg5[%c0_13, %c0_14] : memref<64x1xf32, #tpu.memory_space<vmem>>, vector<64x1xf32>
    %c0_15 = arith.constant 0 : index
    %c0_16 = arith.constant 0 : index
    %8 = vector.load %arg7[%c0_15, %c0_16] : memref<128x1xf32, #tpu.memory_space<vmem>>, vector<128x1xf32>
    %c0_17 = arith.constant 0 : index
    %c0_18 = arith.constant 0 : index
    %9 = vector.load %arg9[%c0_17, %c0_18] : memref<64x1xf32, #tpu.memory_space<vmem>>, vector<64x1xf32>
    %c0_19 = arith.constant 0 : index
    %c0_20 = arith.constant 0 : index
    %10 = vector.load %arg11[%c0_19, %c0_20] : memref<32x1xf32, #tpu.memory_space<vmem>>, vector<32x1xf32>
    %c0_21 = arith.constant 0 : index
    %c0_22 = arith.constant 0 : index
    %11 = vector.load %arg13[%c0_21, %c0_22] : memref<1x1xf32, #tpu.memory_space<vmem>>, vector<1x1xf32>
    %c0_i32 = arith.constant 0 : i32
    %c256_i32 = arith.constant 256 : i32
    %12 = arith.muli %c0_i32, %c256_i32 : i32
    %13 = tpu.assume_multiple %12, 128 : i32
    %c0_23 = arith.constant 0 : index
    %14 = arith.index_cast %13 : i32 to index
    %15 = vector.load %arg1[%c0_23, %14] : memref<4x256xf32, #tpu.memory_space<vmem>>, vector<4x256xf32>
    %16 = arith.truncf %15 : vector<4x256xf32> to vector<4x256xbf16>
    %cst = arith.constant dense<0.000000e+00> : vector<32x256xf32>
    %17 = tpu.matmul %0, %16, %cst {dimension_numbers = #tpu.dot_dimension_numbers<[1], [0], [0], [1], [0, 0, 1, 1], [], []>} : vector<32x4xbf16>, vector<4x256xbf16>, vector<32x256xf32> -> vector<32x256xf32>
    %18 = vector.broadcast %6 : vector<32x1xf32> to vector<32x256xf32>
    %19 = arith.addf %17, %18 : vector<32x256xf32>
    %cst_24 = arith.constant 0.000000e+00 : f32
    %20 = vector.broadcast %cst_24 : f32 to vector<32x256xf32>
    %21 = arith.maximumf %19, %20 : vector<32x256xf32>
    %22 = arith.truncf %21 : vector<32x256xf32> to vector<32x256xbf16>
    %cst_25 = arith.constant dense<0.000000e+00> : vector<64x256xf32>
    %23 = tpu.matmul %1, %22, %cst_25 {dimension_numbers = #tpu.dot_dimension_numbers<[1], [0], [0], [1], [0, 0, 1, 1], [], []>} : vector<64x32xbf16>, vector<32x256xbf16>, vector<64x256xf32> -> vector<64x256xf32>
    %24 = vector.broadcast %7 : vector<64x1xf32> to vector<64x256xf32>
    %25 = arith.addf %23, %24 : vector<64x256xf32>
    %cst_26 = arith.constant 0.000000e+00 : f32
    %26 = vector.broadcast %cst_26 : f32 to vector<64x256xf32>
    %27 = arith.maximumf %25, %26 : vector<64x256xf32>
    %28 = arith.truncf %27 : vector<64x256xf32> to vector<64x256xbf16>
    %cst_27 = arith.constant dense<0.000000e+00> : vector<128x256xf32>
    %29 = tpu.matmul %2, %28, %cst_27 {dimension_numbers = #tpu.dot_dimension_numbers<[1], [0], [0], [1], [0, 0, 1, 1], [], []>} : vector<128x64xbf16>, vector<64x256xbf16>, vector<128x256xf32> -> vector<128x256xf32>
    %30 = vector.broadcast %8 : vector<128x1xf32> to vector<128x256xf32>
    %31 = arith.addf %29, %30 : vector<128x256xf32>
    %cst_28 = arith.constant 0.000000e+00 : f32
    %32 = vector.broadcast %cst_28 : f32 to vector<128x256xf32>
    %33 = arith.maximumf %31, %32 : vector<128x256xf32>
    %34 = arith.truncf %33 : vector<128x256xf32> to vector<128x256xbf16>
    %cst_29 = arith.constant dense<0.000000e+00> : vector<64x256xf32>
    %35 = tpu.matmul %3, %34, %cst_29 {dimension_numbers = #tpu.dot_dimension_numbers<[1], [0], [0], [1], [0, 0, 1, 1], [], []>} : vector<64x128xbf16>, vector<128x256xbf16>, vector<64x256xf32> -> vector<64x256xf32>
    %36 = vector.broadcast %9 : vector<64x1xf32> to vector<64x256xf32>
    %37 = arith.addf %35, %36 : vector<64x256xf32>
    %cst_30 = arith.constant 0.000000e+00 : f32
    %38 = vector.broadcast %cst_30 : f32 to vector<64x256xf32>
    %39 = arith.maximumf %37, %38 : vector<64x256xf32>
    %40 = arith.truncf %39 : vector<64x256xf32> to vector<64x256xbf16>
    %cst_31 = arith.constant dense<0.000000e+00> : vector<32x256xf32>
    %41 = tpu.matmul %4, %40, %cst_31 {dimension_numbers = #tpu.dot_dimension_numbers<[1], [0], [0], [1], [0, 0, 1, 1], [], []>} : vector<32x64xbf16>, vector<64x256xbf16>, vector<32x256xf32> -> vector<32x256xf32>
    %42 = vector.broadcast %10 : vector<32x1xf32> to vector<32x256xf32>
    %43 = arith.addf %41, %42 : vector<32x256xf32>
    %cst_32 = arith.constant 0.000000e+00 : f32
    %44 = vector.broadcast %cst_32 : f32 to vector<32x256xf32>
    %45 = arith.maximumf %43, %44 : vector<32x256xf32>
    %46 = arith.truncf %45 : vector<32x256xf32> to vector<32x256xbf16>
    %cst_33 = arith.constant dense<0.000000e+00> : vector<1x256xf32>
    %47 = tpu.matmul %5, %46, %cst_33 {dimension_numbers = #tpu.dot_dimension_numbers<[1], [0], [0], [1], [0, 0, 1, 1], [], []>} : vector<1x32xbf16>, vector<32x256xbf16>, vector<1x256xf32> -> vector<1x256xf32>
    %48 = vector.broadcast %11 : vector<1x1xf32> to vector<1x256xf32>
    %49 = arith.addf %47, %48 : vector<1x256xf32>
    %c0_34 = arith.constant 0 : index
    %50 = arith.index_cast %13 : i32 to index
    %51 = vector.load %arg14[%c0_34, %50] : memref<1x256xf32, #tpu.memory_space<vmem>>, vector<1x256xf32>
    tpu.vector_store %arg14[%c0_34, %50], %49 {strides = array<i32>} : memref<1x256xf32, #tpu.memory_space<vmem>>, vector<1x256xf32>,
    %c1_i32 = arith.constant 1 : i32
    return
  }
  func.func @transform_0(%arg0: i32) -> (i32, i32) {
    %c0_i32 = arith.constant 0 : i32
    %c0_i32_0 = arith.constant 0 : i32
    return %c0_i32, %arg0 : i32, i32
  }
  func.func @transform_1(%arg0: i32) -> (i32, i32) {
    %c0_i32 = arith.constant 0 : i32
    %c0_i32_0 = arith.constant 0 : i32
    %c0_i32_1 = arith.constant 0 : i32
    return %c0_i32, %c0_i32_0 : i32, i32
  }
  func.func @transform_2(%arg0: i32) -> (i32, i32) {
    %c0_i32 = arith.constant 0 : i32
    %c0_i32_0 = arith.constant 0 : i32
    %c0_i32_1 = arith.constant 0 : i32
    return %c0_i32, %c0_i32_0 : i32, i32
  }
  func.func @transform_3(%arg0: i32) -> (i32, i32) {
    %c0_i32 = arith.constant 0 : i32
    %c0_i32_0 = arith.constant 0 : i32
    %c0_i32_1 = arith.constant 0 : i32
    return %c0_i32, %c0_i32_0 : i32, i32
  }
  func.func @transform_4(%arg0: i32) -> (i32, i32) {
    %c0_i32 = arith.constant 0 : i32
    %c0_i32_0 = arith.constant 0 : i32
    %c0_i32_1 = arith.constant 0 : i32
    return %c0_i32, %c0_i32_0 : i32, i32
  }
  func.func @transform_5(%arg0: i32) -> (i32, i32) {
    %c0_i32 = arith.constant 0 : i32
    %c0_i32_0 = arith.constant 0 : i32
    %c0_i32_1 = arith.constant 0 : i32
    return %c0_i32, %c0_i32_0 : i32, i32
  }
  func.func @transform_6(%arg0: i32) -> (i32, i32) {
    %c0_i32 = arith.constant 0 : i32
    %c0_i32_0 = arith.constant 0 : i32
    %c0_i32_1 = arith.constant 0 : i32
    return %c0_i32, %c0_i32_0 : i32, i32
  }
  func.func @transform_7(%arg0: i32) -> (i32, i32) {
    %c0_i32 = arith.constant 0 : i32
    %c0_i32_0 = arith.constant 0 : i32
    %c0_i32_1 = arith.constant 0 : i32
    return %c0_i32, %c0_i32_0 : i32, i32
  }
  func.func @transform_8(%arg0: i32) -> (i32, i32) {
    %c0_i32 = arith.constant 0 : i32
    %c0_i32_0 = arith.constant 0 : i32
    %c0_i32_1 = arith.constant 0 : i32
    return %c0_i32, %c0_i32_0 : i32, i32
  }
  func.func @transform_9(%arg0: i32) -> (i32, i32) {
    %c0_i32 = arith.constant 0 : i32
    %c0_i32_0 = arith.constant 0 : i32
    %c0_i32_1 = arith.constant 0 : i32
    return %c0_i32, %c0_i32_0 : i32, i32
  }
  func.func @transform_10(%arg0: i32) -> (i32, i32) {
    %c0_i32 = arith.constant 0 : i32
    %c0_i32_0 = arith.constant 0 : i32
    %c0_i32_1 = arith.constant 0 : i32
    return %c0_i32, %c0_i32_0 : i32, i32
  }
  func.func @transform_11(%arg0: i32) -> (i32, i32) {
    %c0_i32 = arith.constant 0 : i32
    %c0_i32_0 = arith.constant 0 : i32
    %c0_i32_1 = arith.constant 0 : i32
    return %c0_i32, %c0_i32_0 : i32, i32
  }
  func.func @transform_12(%arg0: i32) -> (i32, i32) {
    %c0_i32 = arith.constant 0 : i32
    %c0_i32_0 = arith.constant 0 : i32
    %c0_i32_1 = arith.constant 0 : i32
    return %c0_i32, %c0_i32_0 : i32, i32
  }
  func.func @transform_13(%arg0: i32) -> (i32, i32) {
    %c0_i32 = arith.constant 0 : i32
    %c0_i32_0 = arith.constant 0 : i32
    return %c0_i32, %arg0 : i32, i32
  }
}

</mosaic_0001>

<bundles_post_ra>
// kernel: basic_nn_forward.1
= control target key start
LH: loop header
LB: loop body
LE: loop exit
PB: predicated region body
PF: predicated region fallthrough
CT: control target
= control target key end

     0   :  { %vm172_vm0 = vcmask 1041408   ;;  %v1125_v1 = vmov 0   ;;  %vm165_vm1 = vcmask 31744   ;;  %vm304_vm2 = vcmask 261120   ;;  %s1429_s0 = inlined_call_operand.vmem [shape: f32[4,256], index: 0, kind: input, shape index: {}]   ;;  %s1430_s1 = inlined_call_operand.vmem [shape: bf16[32,4], index: 1, kind: input, shape index: {}]   ;;  %s1431_s2 = inlined_call_operand.vmem [shape: f32[32,1], index: 2, kind: input, shape index: {}]   ;;  %s1432_s12 = inlined_call_operand.<no memory space> [shape: f32[1,1], index: 12, kind: input, shape index: {}]   ;;  %s1433_s4 = inlined_call_operand.vmem [shape: f32[64,1], index: 4, kind: input, shape index: {}]   ;;  %s1434_s6 = inlined_call_operand.vmem [shape: f32[128,1], index: 6, kind: input, shape index: {}]   ;;  %s1435_s8 = inlined_call_operand.vmem [shape: f32[64,1], index: 8, kind: input, shape index: {}]   ;;  %s1436_s10 = inlined_call_operand.vmem [shape: f32[32,1], index: 10, kind: input, shape index: {}]   ;;  %s1437_s3 = inlined_call_operand.vmem [shape: bf16[64,32], index: 3, kind: input, shape index: {}]   ;;  %s1438_s5 = inlined_call_operand.vmem [shape: bf16[128,64], index: 5, kind: input, shape index: {}]   ;;  %s1439_s7 = inlined_call_operand.vmem [shape: bf16[64,128], index: 7, kind: input, shape index: {}]   ;;  %s1440_s9 = inlined_call_operand.vmem [shape: bf16[32,64], index: 9, kind: input, shape index: {}]   ;;  %s1441_s11 = inlined_call_operand.vmem [shape: bf16[1,32], index: 11, kind: input, shape index: {}]   ;;  %s1442_s13 = inlined_call_operand.vmem [shape: f32[1,256], index: 13, kind: output, shape index: {}]  }
   0x1   :  { %v129_v0 = vld [vmem:[%s1429_s0] sm:$0xff]  ;;  %211 = vmatprep.mubr.bf16.mxu0 %v1125_v1  ;;  %1102 = vset.pattern.permute.xlu0 %v1125_v1  ;;  %v18_v2 = vstv %s1432_s12  ;;  %v89_v8 = vld [vmem:[%s1431_s2 + $0x8] sm:$0xff]  ;;  %v90_v9 = vld [vmem:[%s1431_s2 + $0x10] sm:$0xff]  ;;  %vm534_vm3 = vcmask 523264  }
   0x2   :  { %v131_v3 = vcombine.high %v129_v0, %v129_v0  ;;  %v133_v4 = vpack.c.bf16 %v129_v0, %v129_v0  ;;  %v88_v5 = vld [vmem:[%s1431_s2] sm:$0xff]  ;;  %1103 = vset.pattern.permute.xlu1 %v1125_v1  ;;  %19 = vst [vmem:[#allocation2] sm:$0x1] %v18_v2  ;;  %349 = vmatprep.mubr.bf16.mxu1 %v1125_v1  ;;  %v91_v11 = vld [vmem:[%s1431_s2 + $0x18] sm:$0xff]  ;;  %v93_v13 = vld [vmem:[%s1433_s4 + $0x8] sm:$0xff] }
   0x3   :  { %137 = vperm.xlu0 %1102, %v88_v5   ;;  %147 = vperm.xlu1 %1103, %v90_v9   ;;  %v1105_v10 = vld [vmem:[%s1430_s1] sm:$0xff]   ;;  %v94_v14 = vld [vmem:[%s1433_s4 + $0x10] sm:$0xff]  ;;  %v1106_v15 = vld [vmem:[%s1430_s1 + $0x8] sm:$0xff]  }
   0x4   :  { %v134_v6 = vpack.c.bf16 %v131_v3, %v131_v3  ;;  %v174_v7 = vsel %vm172_vm0, %v133_v4, 0  ;;  %v92_v12 = vld [vmem:[%s1433_s4] sm:$0xff]  ;;  %v95_v16 = vld [vmem:[%s1433_s4 + $0x18] sm:$0xff]  ;;  %v97_v18 = vld [vmem:[%s1433_s4 + $0x28] sm:$0xff] }
   0x5   :  { %v96_v17 = vld [vmem:[%s1433_s4 + $0x20] sm:$0xff]  ;;  %v98_v19 = vld [vmem:[%s1433_s4 + $0x30] sm:$0xff]  ;;  %v99_v20 = vld [vmem:[%s1433_s4 + $0x38] sm:$0xff] }
   0x6   :  { %1064 = vmatprep.subr.msk.bf16.mxu0 %vm172_vm0, %v134_v6  ;;  %v100_v21 = vld [vmem:[%s1434_s6] sm:$0xff]  ;;  %v101_v22 = vld [vmem:[%s1434_s6 + $0x8] sm:$0xff]  ;;  %v102_v23 = vld [vmem:[%s1434_s6 + $0x10] sm:$0xff] }
   0x7   :  { %180 = vmatpush1.bf16.msra.mxu0 %v174_v7  ;;  %142 = vperm.xlu0 %1102, %v89_v8   ;;  %v103_v24 = vld [vmem:[%s1434_s6 + $0x18] sm:$0xff]  ;;  %v104_v25 = vld [vmem:[%s1434_s6 + $0x20] sm:$0xff]  ;;  %v105_v26 = vld [vmem:[%s1434_s6 + $0x28] sm:$0xff] }
   0x8   :  { %152 = vperm.xlu1 %1103, %v91_v11   ;;  %v106_v27 = vld [vmem:[%s1434_s6 + $0x30] sm:$0xff]  ;;  %v107_v28 = vld [vmem:[%s1434_s6 + $0x38] sm:$0xff]  ;;  %v108_v29 = vld [vmem:[%s1434_s6 + $0x40] sm:$0xff] }
   0x9   :  { %v109_v30 = vld [vmem:[%s1434_s6 + $0x48] sm:$0xff]  ;;  %v110_v31 = vld [vmem:[%s1434_s6 + $0x50] sm:$0xff]  ;;  %v111_v32 = vld [vmem:[%s1434_s6 + $0x58] sm:$0xff] }
   0xa   :  { %1065 = vmatmul.mubr.msk.bf16.vlgmr.msra.gmra.mrb[0].mxu0 %vm165_vm1, %v1105_v10  ;;  %v112_v33 = vld [vmem:[%s1434_s6 + $0x60] sm:$0xff]  ;;  %v113_v34 = vld [vmem:[%s1434_s6 + $0x68] sm:$0xff]  ;;  %v114_v35 = vld [vmem:[%s1434_s6 + $0x70] sm:$0xff] }
   0xb   :  { %221 = vmatprep.mubr.bf16.mxu0 %v1125_v1  ;;  %246 = vperm.xlu0 %1102, %v92_v12   ;;  %v115_v36 = vld [vmem:[%s1434_s6 + $0x78] sm:$0xff]  ;;  %v116_v37 = vld [vmem:[%s1435_s8] sm:$0xff]  ;;  %v117_v38 = vld [vmem:[%s1435_s8 + $0x8] sm:$0xff] }
   0xc   :  { %251 = vperm.xlu1 %1103, %v93_v13   ;;  %v118_v39 = vld [vmem:[%s1435_s8 + $0x10] sm:$0xff]  ;;  %v119_v40 = vld [vmem:[%s1435_s8 + $0x18] sm:$0xff]  ;;  %v120_v41 = vld [vmem:[%s1435_s8 + $0x20] sm:$0xff] }
   0xd   :  { %v121_v42 = vld [vmem:[%s1435_s8 + $0x28] sm:$0xff]  ;;  %v122_v43 = vld [vmem:[%s1435_s8 + $0x30] sm:$0xff]  ;;  %v123_v44 = vld [vmem:[%s1435_s8 + $0x38] sm:$0xff] }
   0xe   :  { %v124_v45 = vld [vmem:[%s1436_s10] sm:$0xff]  ;;  %v125_v46 = vld [vmem:[%s1436_s10 + $0x8] sm:$0xff]  ;;  %v126_v47 = vld [vmem:[%s1436_s10 + $0x10] sm:$0xff] }
   0xf   :  { %256 = vperm.xlu0 %1102, %v94_v14   ;;  %v127_v48 = vld [vmem:[%s1436_s10 + $0x18] sm:$0xff]  ;;  %v128_v49 = vld [vmem:[#allocation2] sm:$0x1] }
  0x10   :  { %261 = vperm.xlu1 %1103, %v95_v16  }
  0x12   :  { %1066 = vmatmul.mubr.msk.bf16.gmra.mrb[4].mxu0 %vm165_vm1, %v1106_v15 }
  0x13   :  { %266 = vperm.xlu0 %1102, %v96_v17   ;;  %591 = vmatprep.mubr.bf16.mxu0 %v1125_v1 }
  0x14   :  { %271 = vperm.xlu1 %1103, %v97_v18  }
  0x17   :  { %276 = vperm.xlu0 %1102, %v98_v19   ;;  %v1107_v19 = vld [vmem:[%s1437_s3] sm:$0xff]  }
  0x18   :  { %281 = vperm.xlu1 %1103, %v99_v20   ;;  %v1108_v20 = vld [vmem:[%s1437_s3 + $0x8] sm:$0xff]  }
  0x1b   :  { %416 = vperm.xlu0 %1102, %v100_v21   ;;  %v1109_v21 = vld [vmem:[%s1437_s3 + $0x10] sm:$0xff]  }
  0x1c   :  { %421 = vperm.xlu1 %1103, %v101_v22   ;;  %v1110_v22 = vld [vmem:[%s1437_s3 + $0x18] sm:$0xff]  }
  0x1f   :  { %426 = vperm.xlu0 %1102, %v102_v23  }
  0x20   :  { %431 = vperm.xlu1 %1103, %v103_v24  }
  0x23   :  { %436 = vperm.xlu0 %1102, %v104_v25  }
  0x24   :  { %441 = vperm.xlu1 %1103, %v105_v26  }
  0x27   :  { %446 = vperm.xlu0 %1102, %v106_v27  }
  0x28   :  { %451 = vperm.xlu1 %1103, %v107_v28  }
  0x2b   :  { %456 = vperm.xlu0 %1102, %v108_v29  }
  0x2c   :  { %461 = vperm.xlu1 %1103, %v109_v30  }
  0x2f   :  { %466 = vperm.xlu0 %1102, %v110_v31  }
  0x30   :  { %471 = vperm.xlu1 %1103, %v111_v32  }
  0x33   :  { %476 = vperm.xlu0 %1102, %v112_v33  }
  0x34   :  { %481 = vperm.xlu1 %1103, %v113_v34  }
  0x37   :  { %486 = vperm.xlu0 %1102, %v114_v35  }
  0x38   :  { %491 = vperm.xlu1 %1103, %v115_v36  }
  0x3b   :  { %722 = vperm.xlu0 %1102, %v116_v37  }
  0x3c   :  { %727 = vperm.xlu1 %1103, %v117_v38  }
  0x3f   :  { %732 = vperm.xlu0 %1102, %v118_v39  }
  0x40   :  { %737 = vperm.xlu1 %1103, %v119_v40  }
  0x43   :  { %742 = vperm.xlu0 %1102, %v120_v41  }
  0x44   :  { %747 = vperm.xlu1 %1103, %v121_v42  }
  0x47   :  { %752 = vperm.xlu0 %1102, %v122_v43  }
  0x48   :  { %757 = vperm.xlu1 %1103, %v123_v44  }
  0x4b   :  { %883 = vperm.xlu0 %1102, %v124_v45  }
  0x4c   :  { %888 = vperm.xlu1 %1103, %v125_v46  }
  0x4f   :  { %893 = vperm.xlu0 %1102, %v126_v47  }
  0x50   :  { %898 = vperm.xlu1 %1103, %v127_v48  }
  0x53   :  { %984 = vperm.xlu0 %1102, %v128_v49  }
  0x82   :  { %v138_v50 = vpop.permute.xlu0 %137  ;;  %v148_v59 = vpop.permute.xlu1 %147 }
  0x86   :  { %v143_v54 = vpop.permute.xlu0 %142 }
  0x87   :  { %v153_v7 = vpop.permute.xlu1 %152 }
  0x8a   :  { %v247_v23 = vpop.permute.xlu0 %246 }
  0x8b   :  { %v252_v27 = vpop.permute.xlu1 %251 }
  0x8e   :  { %v257_v38 = vpop.permute.xlu0 %256 }
  0x8f   :  { %v262_v43 = vpop.permute.xlu1 %261 }
  0xdd   :  { %v213_v51 = vpop.f32.mrb[0].mxu0 }
  0xde   :  { %v214_v52 = vadd.f32 %v213_v51, %v138_v50  ;;  %v215_v53 = vpop.f32.mrb[1].mxu0 }
  0xdf   :  { %v216_v55 = vadd.f32 %v215_v53, %v138_v50  ;;  %v217_v56 = vpop.f32.mrb[2].mxu0 }
  0xe0   :  { %v218_v57 = vadd.f32 %v217_v56, %v143_v54  ;;  %v219_v58 = vpop.f32.mrb[3].mxu0  ;;  %v232_v61 = vmax.f32 %v214_v52, 0.0 }
  0xe1   :  { %v220_v60 = vadd.f32 %v219_v58, %v143_v54  ;;  %v233_v63 = vmax.f32 %v216_v55, 0.0  ;;  %v267_v54 = vpop.permute.xlu0 %266 }
  0xe2   :  { %v234_v62 = vmax.f32 %v218_v57, 0.0 }
  0xe3   :  { %v235_v0 = vmax.f32 %v220_v60, 0.0 }
  0xe4   :  { %v240_v2 = vpack.c.bf16 %v234_v62, %v232_v61 }
  0xe5   :  { %v223_v3 = vpop.f32.mrb[4].mxu0  ;;  %v241_v4 = vpack.c.bf16 %v235_v0, %v233_v63 }
  0xe6   :  { %v224_v5 = vadd.f32 %v223_v3, %v148_v59  ;;  %v225_v6 = vpop.f32.mrb[5].mxu0 }
  0xe7   :  { %v226_v8 = vadd.f32 %v225_v6, %v148_v59  ;;  %v227_v9 = vpop.f32.mrb[6].mxu0  ;;  %317 = vmatprep.subr.bf16.mxu1 %v241_v4  ;;  %v272_v59 = vpop.permute.xlu1 %271 }
  0xe8   :  { %v228_v10 = vadd.f32 %v227_v9, %v153_v7  ;;  %v229_v11 = vpop.f32.mrb[7].mxu0  ;;  %318 = vmatpush1.bf16.msra.mxu1 %v240_v2  ;;  %v236_v13 = vmax.f32 %v224_v5, 0.0 }
  0xe9   :  { %v230_v12 = vadd.f32 %v229_v11, %v153_v7  ;;  %v237_v15 = vmax.f32 %v226_v8, 0.0  ;;  %v277_v7 = vpop.permute.xlu0 %276 }
  0xea   :  { %v238_v14 = vmax.f32 %v228_v10, 0.0 }
  0xeb   :  { %v239_v16 = vmax.f32 %v230_v12, 0.0  ;;  %v282_v12 = vpop.permute.xlu1 %281 }
  0xec   :  { %v242_v17 = vpack.c.bf16 %v238_v14, %v236_v13 }
  0xed   :  { %v243_v18 = vpack.c.bf16 %v239_v16, %v237_v15 }
  0xef   :  { %319 = vmatprep.subr.bf16.mxu1 %v243_v18 }
  0xf0   :  { %320 = vmatpush1.bf16.msra.mxu1 %v242_v17 }
  0xf3   :  { %1071 = vmatmul.mubr.msk.bf16.vlgmr.msra.gmra.mrb[0].mxu1 %vm304_vm2, %v1107_v19 }
  0xf4   :  { %359 = vmatprep.mubr.bf16.mxu1 %v1125_v1 }
  0xfb   :  { %1072 = vmatmul.mubr.msk.bf16.gmra.mrb[4].mxu1 %vm304_vm2, %v1108_v20 }
  0xfc   :  { %369 = vmatprep.mubr.bf16.mxu1 %v1125_v1 }
 0x103   :  { %1073 = vmatmul.mubr.msk.bf16.gmra.mrb[8].mxu1 %vm304_vm2, %v1109_v21 }
 0x104   :  { %379 = vmatprep.mubr.bf16.mxu1 %v1125_v1 }
 0x10b   :  { %1074 = vmatmul.mubr.msk.bf16.gmra.mrb[12].mxu1 %vm304_vm2, %v1110_v22 }
 0x10c   :  { %816 = vmatprep.mubr.bf16.mxu1 %v1125_v1 }
 0x1c6   :  { %v351_v24 = vpop.f32.mrb[0].mxu1 }
 0x1c7   :  { %v352_v25 = vadd.f32 %v351_v24, %v247_v23  ;;  %v353_v26 = vpop.f32.mrb[1].mxu1  ;;  %v1111_v24 = vld [vmem:[%s1438_s5] sm:$0xff]  }
 0x1c8   :  { %v354_v28 = vadd.f32 %v353_v26, %v247_v23  ;;  %v355_v29 = vpop.f32.mrb[2].mxu1  ;;  %v1113_v26 = vld [vmem:[%s1438_s5 + $0x10] sm:$0xff]  }
 0x1c9   :  { %v356_v30 = vadd.f32 %v355_v29, %v252_v27  ;;  %v357_v31 = vpop.f32.mrb[3].mxu1  ;;  %v390_v33 = vmax.f32 %v352_v25, 0.0  ;;  %v1112_v25 = vld [vmem:[%s1438_s5 + $0x8] sm:$0xff]  }
 0x1ca   :  { %v358_v32 = vadd.f32 %v357_v31, %v252_v27  ;;  %v391_v35 = vmax.f32 %v354_v28, 0.0  ;;  %v1114_v27 = vld [vmem:[%s1438_s5 + $0x18] sm:$0xff]   ;;  %v1115_v28 = vld [vmem:[%s1438_s5 + $0x20] sm:$0xff]   ;;  %v1116_v29 = vld [vmem:[%s1438_s5 + $0x28] sm:$0xff]  }
 0x1cb   :  { %v392_v34 = vmax.f32 %v356_v30, 0.0  ;;  %v1117_v30 = vld [vmem:[%s1438_s5 + $0x30] sm:$0xff]   ;;  %v1118_v31 = vld [vmem:[%s1438_s5 + $0x38] sm:$0xff]  }
 0x1cc   :  { %v393_v36 = vmax.f32 %v358_v32, 0.0  ;;  %v417_v32 = vpop.permute.xlu0 %416 }
 0x1cd   :  { %v406_v37 = vpack.c.bf16 %v392_v34, %v390_v33 }
 0x1ce   :  { %v407_v39 = vpack.c.bf16 %v393_v36, %v391_v35  ;;  %v361_v40 = vpop.f32.mrb[4].mxu1  ;;  %v422_v36 = vpop.permute.xlu1 %421 }
 0x1cf   :  { %v362_v41 = vadd.f32 %v361_v40, %v257_v38  ;;  %v363_v42 = vpop.f32.mrb[5].mxu1 }
 0x1d0   :  { %v364_v44 = vadd.f32 %v363_v42, %v257_v38  ;;  %v365_v45 = vpop.f32.mrb[6].mxu1  ;;  %559 = vmatprep.subr.bf16.mxu0 %v407_v39 }
 0x1d1   :  { %v366_v46 = vadd.f32 %v365_v45, %v262_v43  ;;  %v367_v47 = vpop.f32.mrb[7].mxu1  ;;  %560 = vmatpush1.bf16.msra.mxu0 %v406_v37  ;;  %v394_v49 = vmax.f32 %v362_v41, 0.0 }
 0x1d2   :  { %v368_v48 = vadd.f32 %v367_v47, %v262_v43  ;;  %v395_v51 = vmax.f32 %v364_v44, 0.0  ;;  %v427_v47 = vpop.permute.xlu0 %426 }
 0x1d3   :  { %v396_v50 = vmax.f32 %v366_v46, 0.0 }
 0x1d4   :  { %v397_v52 = vmax.f32 %v368_v48, 0.0 }
 0x1d5   :  { %v408_v53 = vpack.c.bf16 %v396_v50, %v394_v49 }
 0x1d6   :  { %v409_v55 = vpack.c.bf16 %v397_v52, %v395_v51  ;;  %v371_v56 = vpop.f32.mrb[8].mxu1  ;;  %v432_v52 = vpop.permute.xlu1 %431 }
 0x1d7   :  { %v372_v57 = vadd.f32 %v371_v56, %v267_v54  ;;  %v373_v58 = vpop.f32.mrb[9].mxu1 }
 0x1d8   :  { %v374_v60 = vadd.f32 %v373_v58, %v267_v54  ;;  %v375_v61 = vpop.f32.mrb[10].mxu1  ;;  %561 = vmatprep.subr.bf16.mxu0 %v409_v55 }
 0x1d9   :  { %v376_v62 = vadd.f32 %v375_v61, %v272_v59  ;;  %v377_v63 = vpop.f32.mrb[11].mxu1  ;;  %562 = vmatpush1.bf16.msra.mxu0 %v408_v53  ;;  %v398_v2 = vmax.f32 %v372_v57, 0.0 }
 0x1da   :  { %v378_v0 = vadd.f32 %v377_v63, %v272_v59  ;;  %v399_v4 = vmax.f32 %v374_v60, 0.0  ;;  %v437_v63 = vpop.permute.xlu0 %436 }
 0x1db   :  { %v400_v3 = vmax.f32 %v376_v62, 0.0 }
 0x1dc   :  { %v401_v5 = vmax.f32 %v378_v0, 0.0 }
 0x1dd   :  { %v410_v6 = vpack.c.bf16 %v400_v3, %v398_v2 }
 0x1de   :  { %v411_v8 = vpack.c.bf16 %v401_v5, %v399_v4  ;;  %v381_v9 = vpop.f32.mrb[12].mxu1  ;;  %v442_v5 = vpop.permute.xlu1 %441 }
 0x1df   :  { %v382_v10 = vadd.f32 %v381_v9, %v277_v7  ;;  %v383_v11 = vpop.f32.mrb[13].mxu1 }
 0x1e0   :  { %v384_v13 = vadd.f32 %v383_v11, %v277_v7  ;;  %v385_v14 = vpop.f32.mrb[14].mxu1  ;;  %563 = vmatprep.subr.bf16.mxu0 %v411_v8 }
 0x1e1   :  { %v386_v15 = vadd.f32 %v385_v14, %v282_v12  ;;  %v387_v16 = vpop.f32.mrb[15].mxu1  ;;  %564 = vmatpush1.bf16.msra.mxu0 %v410_v6  ;;  %v402_v18 = vmax.f32 %v382_v10, 0.0 }
 0x1e2   :  { %v388_v17 = vadd.f32 %v387_v16, %v282_v12  ;;  %v403_v20 = vmax.f32 %v384_v13, 0.0  ;;  %v447_v16 = vpop.permute.xlu0 %446 }
 0x1e3   :  { %v404_v19 = vmax.f32 %v386_v15, 0.0 }
 0x1e4   :  { %v405_v21 = vmax.f32 %v388_v17, 0.0 }
 0x1e5   :  { %v412_v22 = vpack.c.bf16 %v404_v19, %v402_v18 }
 0x1e6   :  { %v413_v23 = vpack.c.bf16 %v405_v21, %v403_v20  ;;  %v452_v21 = vpop.permute.xlu1 %451 }
 0x1e8   :  { %565 = vmatprep.subr.bf16.mxu0 %v413_v23 }
 0x1e9   :  { %566 = vmatpush1.bf16.msra.mxu0 %v412_v22 }
 0x1ec   :  { %1083 = vmatmul.mubr.msk.bf16.vlgmr.msra.gmra.mrb[8].mxu0 %vm534_vm3, %v1111_v24 }
 0x1ed   :  { %601 = vmatprep.mubr.bf16.mxu0 %v1125_v1 }
 0x1f4   :  { %1084 = vmatmul.mubr.msk.bf16.gmra.mrb[12].mxu0 %vm534_vm3, %v1112_v25 }
 0x1f5   :  { %611 = vmatprep.mubr.bf16.mxu0 %v1125_v1 }
 0x1fc   :  { %1085 = vmatmul.mubr.msk.bf16.gmra.mrb[16].mxu0 %vm534_vm3, %v1113_v26 }
 0x1fd   :  { %621 = vmatprep.mubr.bf16.mxu0 %v1125_v1 }
 0x204   :  { %1086 = vmatmul.mubr.msk.bf16.gmra.mrb[20].mxu0 %vm534_vm3, %v1114_v27 }
 0x205   :  { %631 = vmatprep.mubr.bf16.mxu0 %v1125_v1 }
 0x20c   :  { %1087 = vmatmul.mubr.msk.bf16.gmra.mrb[24].mxu0 %vm534_vm3, %v1115_v28 }
 0x20d   :  { %641 = vmatprep.mubr.bf16.mxu0 %v1125_v1 }
 0x214   :  { %1088 = vmatmul.mubr.msk.bf16.gmra.mrb[28].mxu0 %vm534_vm3, %v1116_v29 }
 0x215   :  { %651 = vmatprep.mubr.bf16.mxu0 %v1125_v1 }
 0x21c   :  { %1089 = vmatmul.mubr.msk.bf16.gmra.mrb[32].mxu0 %vm534_vm3, %v1117_v30 }
 0x21d   :  { %661 = vmatprep.mubr.bf16.mxu0 %v1125_v1 }
 0x224   :  { %1090 = vmatmul.mubr.msk.bf16.gmra.mrb[36].mxu0 %vm534_vm3, %v1118_v31 }
 0x225   :  { %1026 = vmatprep.mubr.bf16.mxu0 %v1125_v1 }
 0x2bf   :  { %v593_v33 = vpop.f32.mrb[8].mxu0 }
 0x2c0   :  { %v594_v34 = vadd.f32 %v593_v33, %v417_v32  ;;  %v595_v35 = vpop.f32.mrb[9].mxu0 }
 0x2c1   :  { %v596_v37 = vadd.f32 %v595_v35, %v417_v32  ;;  %v597_v38 = vpop.f32.mrb[10].mxu0  ;;  %v457_v32 = vpop.permute.xlu0 %456 }
 0x2c2   :  { %v598_v39 = vadd.f32 %v597_v38, %v422_v36  ;;  %v599_v40 = vpop.f32.mrb[11].mxu0  ;;  %v672_v42 = vmax.f32 %v594_v34, 0.0 }
 0x2c3   :  { %v600_v41 = vadd.f32 %v599_v40, %v422_v36  ;;  %v673_v44 = vmax.f32 %v596_v37, 0.0  ;;  %v462_v37 = vpop.permute.xlu1 %461 }
 0x2c4   :  { %v674_v43 = vmax.f32 %v598_v39, 0.0 }
 0x2c5   :  { %v675_v45 = vmax.f32 %v600_v41, 0.0 }
 0x2c6   :  { %v704_v46 = vpack.c.bf16 %v674_v43, %v672_v42 }
 0x2c7   :  { %v705_v48 = vpack.c.bf16 %v675_v45, %v673_v44  ;;  %v603_v49 = vpop.f32.mrb[12].mxu0 }
 0x2c8   :  { %v604_v50 = vadd.f32 %v603_v49, %v427_v47  ;;  %v605_v51 = vpop.f32.mrb[13].mxu0 }
 0x2c9   :  { %v606_v53 = vadd.f32 %v605_v51, %v427_v47  ;;  %v607_v54 = vpop.f32.mrb[14].mxu0  ;;  %784 = vmatprep.subr.bf16.mxu1 %v705_v48  ;;  %v467_v48 = vpop.permute.xlu0 %466 }
 0x2ca   :  { %v608_v55 = vadd.f32 %v607_v54, %v432_v52  ;;  %v609_v56 = vpop.f32.mrb[15].mxu0  ;;  %785 = vmatpush1.bf16.msra.mxu1 %v704_v46  ;;  %v676_v58 = vmax.f32 %v604_v50, 0.0 }
 0x2cb   :  { %v610_v57 = vadd.f32 %v609_v56, %v432_v52  ;;  %v677_v60 = vmax.f32 %v606_v53, 0.0  ;;  %v472_v53 = vpop.permute.xlu1 %471 }
 0x2cc   :  { %v678_v59 = vmax.f32 %v608_v55, 0.0 }
 0x2cd   :  { %v679_v61 = vmax.f32 %v610_v57, 0.0 }
 0x2ce   :  { %v706_v62 = vpack.c.bf16 %v678_v59, %v676_v58 }
 0x2cf   :  { %v707_v0 = vpack.c.bf16 %v679_v61, %v677_v60  ;;  %v613_v2 = vpop.f32.mrb[16].mxu0 }
 0x2d0   :  { %v614_v3 = vadd.f32 %v613_v2, %v437_v63  ;;  %v615_v4 = vpop.f32.mrb[17].mxu0 }
 0x2d1   :  { %v616_v6 = vadd.f32 %v615_v4, %v437_v63  ;;  %v617_v7 = vpop.f32.mrb[18].mxu0  ;;  %786 = vmatprep.subr.bf16.mxu1 %v707_v0  ;;  %v477_v0 = vpop.permute.xlu0 %476 }
 0x2d2   :  { %v618_v8 = vadd.f32 %v617_v7, %v442_v5  ;;  %v619_v9 = vpop.f32.mrb[19].mxu0  ;;  %787 = vmatpush1.bf16.msra.mxu1 %v706_v62  ;;  %v680_v11 = vmax.f32 %v614_v3, 0.0 }
 0x2d3   :  { %v620_v10 = vadd.f32 %v619_v9, %v442_v5  ;;  %v681_v13 = vmax.f32 %v616_v6, 0.0  ;;  %v482_v6 = vpop.permute.xlu1 %481 }
 0x2d4   :  { %v682_v12 = vmax.f32 %v618_v8, 0.0 }
 0x2d5   :  { %v683_v14 = vmax.f32 %v620_v10, 0.0 }
 0x2d6   :  { %v708_v15 = vpack.c.bf16 %v682_v12, %v680_v11 }
 0x2d7   :  { %v709_v17 = vpack.c.bf16 %v683_v14, %v681_v13  ;;  %v623_v18 = vpop.f32.mrb[20].mxu0 }
 0x2d8   :  { %v624_v19 = vadd.f32 %v623_v18, %v447_v16  ;;  %v625_v20 = vpop.f32.mrb[21].mxu0 }
 0x2d9   :  { %v626_v22 = vadd.f32 %v625_v20, %v447_v16  ;;  %v627_v23 = vpop.f32.mrb[22].mxu0  ;;  %788 = vmatprep.subr.bf16.mxu1 %v709_v17  ;;  %v487_v17 = vpop.permute.xlu0 %486 }
 0x2da   :  { %v628_v24 = vadd.f32 %v627_v23, %v452_v21  ;;  %v629_v25 = vpop.f32.mrb[23].mxu0  ;;  %789 = vmatpush1.bf16.msra.mxu1 %v708_v15  ;;  %v684_v27 = vmax.f32 %v624_v19, 0.0 }
 0x2db   :  { %v630_v26 = vadd.f32 %v629_v25, %v452_v21  ;;  %v685_v29 = vmax.f32 %v626_v22, 0.0  ;;  %v492_v22 = vpop.permute.xlu1 %491 }
 0x2dc   :  { %v686_v28 = vmax.f32 %v628_v24, 0.0 }
 0x2dd   :  { %v687_v30 = vmax.f32 %v630_v26, 0.0 }
 0x2de   :  { %v710_v31 = vpack.c.bf16 %v686_v28, %v684_v27 }
 0x2df   :  { %v711_v33 = vpack.c.bf16 %v687_v30, %v685_v29  ;;  %v633_v34 = vpop.f32.mrb[24].mxu0 }
 0x2e0   :  { %v634_v35 = vadd.f32 %v633_v34, %v457_v32  ;;  %v635_v36 = vpop.f32.mrb[25].mxu0  ;;  %v1119_v34 = vld [vmem:[%s1439_s7] sm:$0xff]  }
 0x2e1   :  { %v636_v38 = vadd.f32 %v635_v36, %v457_v32  ;;  %v637_v39 = vpop.f32.mrb[26].mxu0  ;;  %790 = vmatprep.subr.bf16.mxu1 %v711_v33  ;;  %v1121_v36 = vld [vmem:[%s1439_s7 + $0x10] sm:$0xff]  }
 0x2e2   :  { %v638_v40 = vadd.f32 %v637_v39, %v462_v37  ;;  %v639_v41 = vpop.f32.mrb[27].mxu0  ;;  %791 = vmatpush1.bf16.msra.mxu1 %v710_v31  ;;  %v688_v43 = vmax.f32 %v634_v35, 0.0  ;;  %v1120_v35 = vld [vmem:[%s1439_s7 + $0x8] sm:$0xff]  }
 0x2e3   :  { %v640_v42 = vadd.f32 %v639_v41, %v462_v37  ;;  %v689_v45 = vmax.f32 %v636_v38, 0.0  ;;  %v1122_v37 = vld [vmem:[%s1439_s7 + $0x18] sm:$0xff]   ;;  %v723_v38 = vpop.permute.xlu0 %722 }
 0x2e4   :  { %v690_v44 = vmax.f32 %v638_v40, 0.0 }
 0x2e5   :  { %v691_v46 = vmax.f32 %v640_v42, 0.0  ;;  %v728_v42 = vpop.permute.xlu1 %727 }
 0x2e6   :  { %v712_v47 = vpack.c.bf16 %v690_v44, %v688_v43 }
 0x2e7   :  { %v713_v49 = vpack.c.bf16 %v691_v46, %v689_v45  ;;  %v643_v50 = vpop.f32.mrb[28].mxu0 }
 0x2e8   :  { %v644_v51 = vadd.f32 %v643_v50, %v467_v48  ;;  %v645_v52 = vpop.f32.mrb[29].mxu0 }
 0x2e9   :  { %v646_v54 = vadd.f32 %v645_v52, %v467_v48  ;;  %v647_v55 = vpop.f32.mrb[30].mxu0  ;;  %792 = vmatprep.subr.bf16.mxu1 %v713_v49 }
 0x2ea   :  { %v648_v56 = vadd.f32 %v647_v55, %v472_v53  ;;  %v649_v57 = vpop.f32.mrb[31].mxu0  ;;  %793 = vmatpush1.bf16.msra.mxu1 %v712_v47  ;;  %v692_v59 = vmax.f32 %v644_v51, 0.0 }
 0x2eb   :  { %v650_v58 = vadd.f32 %v649_v57, %v472_v53  ;;  %v693_v61 = vmax.f32 %v646_v54, 0.0  ;;  %v733_v53 = vpop.permute.xlu0 %732 }
 0x2ec   :  { %v694_v60 = vmax.f32 %v648_v56, 0.0 }
 0x2ed   :  { %v695_v62 = vmax.f32 %v650_v58, 0.0  ;;  %v738_v58 = vpop.permute.xlu1 %737 }
 0x2ee   :  { %v714_v63 = vpack.c.bf16 %v694_v60, %v692_v59 }
 0x2ef   :  { %v715_v2 = vpack.c.bf16 %v695_v62, %v693_v61  ;;  %v653_v3 = vpop.f32.mrb[32].mxu0 }
 0x2f0   :  { %v654_v4 = vadd.f32 %v653_v3, %v477_v0  ;;  %v655_v5 = vpop.f32.mrb[33].mxu0 }
 0x2f1   :  { %v656_v7 = vadd.f32 %v655_v5, %v477_v0  ;;  %v657_v8 = vpop.f32.mrb[34].mxu0  ;;  %794 = vmatprep.subr.bf16.mxu1 %v715_v2 }
 0x2f2   :  { %v658_v9 = vadd.f32 %v657_v8, %v482_v6  ;;  %v659_v10 = vpop.f32.mrb[35].mxu0  ;;  %795 = vmatpush1.bf16.msra.mxu1 %v714_v63  ;;  %v696_v12 = vmax.f32 %v654_v4, 0.0 }
 0x2f3   :  { %v660_v11 = vadd.f32 %v659_v10, %v482_v6  ;;  %v697_v14 = vmax.f32 %v656_v7, 0.0  ;;  %v743_v6 = vpop.permute.xlu0 %742 }
 0x2f4   :  { %v698_v13 = vmax.f32 %v658_v9, 0.0 }
 0x2f5   :  { %v699_v15 = vmax.f32 %v660_v11, 0.0  ;;  %v748_v11 = vpop.permute.xlu1 %747 }
 0x2f6   :  { %v716_v16 = vpack.c.bf16 %v698_v13, %v696_v12 }
 0x2f7   :  { %v717_v18 = vpack.c.bf16 %v699_v15, %v697_v14  ;;  %v663_v19 = vpop.f32.mrb[36].mxu0 }
 0x2f8   :  { %v664_v20 = vadd.f32 %v663_v19, %v487_v17  ;;  %v665_v21 = vpop.f32.mrb[37].mxu0 }
 0x2f9   :  { %v666_v23 = vadd.f32 %v665_v21, %v487_v17  ;;  %v667_v24 = vpop.f32.mrb[38].mxu0  ;;  %796 = vmatprep.subr.bf16.mxu1 %v717_v18 }
 0x2fa   :  { %v668_v25 = vadd.f32 %v667_v24, %v492_v22  ;;  %v669_v26 = vpop.f32.mrb[39].mxu0  ;;  %797 = vmatpush1.bf16.msra.mxu1 %v716_v16  ;;  %v700_v28 = vmax.f32 %v664_v20, 0.0 }
 0x2fb   :  { %v670_v27 = vadd.f32 %v669_v26, %v492_v22  ;;  %v701_v30 = vmax.f32 %v666_v23, 0.0  ;;  %v753_v22 = vpop.permute.xlu0 %752 }
 0x2fc   :  { %v702_v29 = vmax.f32 %v668_v25, 0.0 }
 0x2fd   :  { %v703_v31 = vmax.f32 %v670_v27, 0.0  ;;  %v758_v27 = vpop.permute.xlu1 %757 }
 0x2fe   :  { %v718_v32 = vpack.c.bf16 %v702_v29, %v700_v28 }
 0x2ff   :  { %v719_v33 = vpack.c.bf16 %v703_v31, %v701_v30 }
 0x301   :  { %798 = vmatprep.subr.bf16.mxu1 %v719_v33 }
 0x302   :  { %799 = vmatpush1.bf16.msra.mxu1 %v718_v32 }
 0x305   :  { %817 = vmatmul.mubr.bf16.vlgmr.msra.gmra.mrb[16].mxu1 %v1119_v34 }
 0x306   :  { %826 = vmatprep.mubr.bf16.mxu1 %v1125_v1 }
 0x30d   :  { %827 = vmatmul.mubr.bf16.gmra.mrb[20].mxu1 %v1120_v35 }
 0x30e   :  { %836 = vmatprep.mubr.bf16.mxu1 %v1125_v1 }
 0x315   :  { %837 = vmatmul.mubr.bf16.gmra.mrb[24].mxu1 %v1121_v36 }
 0x316   :  { %846 = vmatprep.mubr.bf16.mxu1 %v1125_v1 }
 0x31d   :  { %847 = vmatmul.mubr.bf16.gmra.mrb[28].mxu1 %v1122_v37 }
 0x31e   :  { %949 = vmatprep.mubr.bf16.mxu1 %v1125_v1 }
 0x3d8   :  { %v818_v39 = vpop.f32.mrb[16].mxu1 }
 0x3d9   :  { %v819_v40 = vadd.f32 %v818_v39, %v723_v38  ;;  %v820_v41 = vpop.f32.mrb[17].mxu1  ;;  %v1123_v39 = vld [vmem:[%s1440_s9] sm:$0xff]  }
 0x3da   :  { %v821_v43 = vadd.f32 %v820_v41, %v723_v38  ;;  %v822_v44 = vpop.f32.mrb[18].mxu1  ;;  %v884_v41 = vpop.permute.xlu0 %883 }
 0x3db   :  { %v823_v45 = vadd.f32 %v822_v44, %v728_v42  ;;  %v824_v46 = vpop.f32.mrb[19].mxu1  ;;  %v857_v48 = vmax.f32 %v819_v40, 0.0  ;;  %v1124_v40 = vld [vmem:[%s1440_s9 + $0x8] sm:$0xff]  }
 0x3dc   :  { %v825_v47 = vadd.f32 %v824_v46, %v728_v42  ;;  %v858_v50 = vmax.f32 %v821_v43, 0.0 }
 0x3dd   :  { %v859_v49 = vmax.f32 %v823_v45, 0.0  ;;  %v889_v45 = vpop.permute.xlu1 %888 }
 0x3de   :  { %v860_v51 = vmax.f32 %v825_v47, 0.0 }
 0x3df   :  { %v873_v52 = vpack.c.bf16 %v859_v49, %v857_v48 }
 0x3e0   :  { %v874_v54 = vpack.c.bf16 %v860_v51, %v858_v50  ;;  %v828_v55 = vpop.f32.mrb[20].mxu1 }
 0x3e1   :  { %v829_v56 = vadd.f32 %v828_v55, %v733_v53  ;;  %v830_v57 = vpop.f32.mrb[21].mxu1  ;;  %v894_v55 = vpop.permute.xlu0 %893 }
 0x3e2   :  { %v831_v59 = vadd.f32 %v830_v57, %v733_v53  ;;  %v832_v60 = vpop.f32.mrb[22].mxu1  ;;  %917 = vmatprep.subr.bf16.mxu1 %v874_v54 }
 0x3e3   :  { %v833_v61 = vadd.f32 %v832_v60, %v738_v58  ;;  %v834_v62 = vpop.f32.mrb[23].mxu1  ;;  %918 = vmatpush1.bf16.msra.mxu1 %v873_v52  ;;  %v861_v0 = vmax.f32 %v829_v56, 0.0  ;;  %v899_v60 = vpop.permute.xlu1 %898 }
 0x3e4   :  { %v835_v63 = vadd.f32 %v834_v62, %v738_v58  ;;  %v862_v3 = vmax.f32 %v831_v59, 0.0 }
 0x3e5   :  { %v863_v2 = vmax.f32 %v833_v61, 0.0 }
 0x3e6   :  { %v864_v4 = vmax.f32 %v835_v63, 0.0 }
 0x3e7   :  { %v875_v5 = vpack.c.bf16 %v863_v2, %v861_v0 }
 0x3e8   :  { %v876_v7 = vpack.c.bf16 %v864_v4, %v862_v3  ;;  %v838_v8 = vpop.f32.mrb[24].mxu1 }
 0x3e9   :  { %v839_v9 = vadd.f32 %v838_v8, %v743_v6  ;;  %v840_v10 = vpop.f32.mrb[25].mxu1 }
 0x3ea   :  { %v841_v12 = vadd.f32 %v840_v10, %v743_v6  ;;  %v842_v13 = vpop.f32.mrb[26].mxu1  ;;  %919 = vmatprep.subr.bf16.mxu1 %v876_v7  ;;  %v987_v10 = vlaneseq }
 0x3eb   :  { %v843_v14 = vadd.f32 %v842_v13, %v748_v11  ;;  %v844_v15 = vpop.f32.mrb[27].mxu1  ;;  %920 = vmatpush1.bf16.msra.mxu1 %v875_v5  ;;  %v865_v17 = vmax.f32 %v839_v9, 0.0  ;;  %v87_v9 = vld [vmem:[%s1441_s11] sm:$0x1] }
 0x3ec   :  { %v845_v16 = vadd.f32 %v844_v15, %v748_v11  ;;  %v866_v19 = vmax.f32 %v841_v12, 0.0  ;;  %v988_v11 = vshrl.u32 %v987_v10, 7  ;;  %v1126_v12 = vmov 1966171168   ;;  %v985_v15 = vpop.permute.xlu0 %984 }
 0x3ed   :  { %v867_v18 = vmax.f32 %v843_v14, 0.0  ;;  %v1039_v13 = vunpack.c.l.s4 %v1126_v12  ;;  %vm1055_vm4 = vcmp.lt.s32.totalorder %v987_v10, 256 }
 0x3ee   :  { %v868_v20 = vmax.f32 %v845_v16, 0.0  ;;  %v989_v14 = vsub.s32 0, %v988_v11 }
 0x3ef   :  { %v877_v21 = vpack.c.bf16 %v867_v18, %v865_v17  ;;  %v1040_v16 = vunpack.c.0.s8 %v1039_v13 }
 0x3f0   :  { %v878_v23 = vpack.c.bf16 %v868_v20, %v866_v19  ;;  %v848_v24 = vpop.f32.mrb[28].mxu1  ;;  %v990_v17 = vrot.slane %v985_v15, %v989_v14 }
 0x3f1   :  { %v849_v25 = vadd.f32 %v848_v24, %v753_v22  ;;  %v850_v26 = vpop.f32.mrb[29].mxu1 }
 0x3f2   :  { %v851_v28 = vadd.f32 %v850_v26, %v753_v22  ;;  %v852_v29 = vpop.f32.mrb[30].mxu1  ;;  %921 = vmatprep.subr.bf16.mxu1 %v878_v23  ;;  %v1043_v22 = vsub.s32 %v1040_v16, %v988_v11 }
 0x3f3   :  { %v853_v30 = vadd.f32 %v852_v29, %v758_v27  ;;  %v854_v31 = vpop.f32.mrb[31].mxu1  ;;  %922 = vmatpush1.bf16.msra.mxu1 %v877_v21  ;;  %v869_v33 = vmax.f32 %v849_v25, 0.0 }
 0x3f4   :  { %v855_v32 = vadd.f32 %v854_v31, %v758_v27  ;;  %v870_v35 = vmax.f32 %v851_v28, 0.0 }
 0x3f5   :  { %v871_v34 = vmax.f32 %v853_v30, 0.0 }
 0x3f6   :  { %v872_v36 = vmax.f32 %v855_v32, 0.0 }
 0x3f7   :  { %v879_v37 = vpack.c.bf16 %v871_v34, %v869_v33 }
 0x3f8   :  { %v880_v38 = vpack.c.bf16 %v872_v36, %v870_v35 }
 0x3fa   :  { %923 = vmatprep.subr.bf16.mxu1 %v880_v38 }
 0x3fb   :  { %924 = vmatpush1.bf16.msra.mxu1 %v879_v37 }
 0x3fe   :  { %1097 = vmatmul.mubr.msk.bf16.vlgmr.msra.gmra.mrb[32].mxu1 %vm534_vm3, %v1123_v39 }
 0x3ff   :  { %959 = vmatprep.mubr.bf16.mxu1 %v1125_v1 }
 0x406   :  { %1098 = vmatmul.mubr.msk.bf16.gmra.mrb[36].mxu1 %vm534_vm3, %v1124_v40 }
 0x4d1   :  { %v951_v42 = vpop.f32.mrb[32].mxu1 }
 0x4d2   :  { %v952_v43 = vadd.f32 %v951_v42, %v884_v41  ;;  %v953_v44 = vpop.f32.mrb[33].mxu1 }
 0x4d3   :  { %v954_v46 = vadd.f32 %v953_v44, %v884_v41  ;;  %v955_v47 = vpop.f32.mrb[34].mxu1 }
 0x4d4   :  { %v956_v48 = vadd.f32 %v955_v47, %v889_v45  ;;  %v957_v49 = vpop.f32.mrb[35].mxu1  ;;  %v970_v51 = vmax.f32 %v952_v43, 0.0 }
 0x4d5   :  { %v958_v50 = vadd.f32 %v957_v49, %v889_v45  ;;  %v971_v53 = vmax.f32 %v954_v46, 0.0 }
 0x4d6   :  { %v972_v52 = vmax.f32 %v956_v48, 0.0 }
 0x4d7   :  { %v973_v1 = vmax.f32 %v958_v50, 0.0 }
 0x4d8   :  { %v978_v54 = vpack.c.bf16 %v972_v52, %v970_v51 }
 0x4d9   :  { %v979_v56 = vpack.c.bf16 %v973_v1, %v971_v53  ;;  %v961_v57 = vpop.f32.mrb[36].mxu1 }
 0x4da   :  { %v962_v58 = vadd.f32 %v961_v57, %v894_v55  ;;  %v963_v59 = vpop.f32.mrb[37].mxu1 }
 0x4db   :  { %v964_v61 = vadd.f32 %v963_v59, %v894_v55  ;;  %v965_v62 = vpop.f32.mrb[38].mxu1  ;;  %994 = vmatprep.subr.bf16.mxu0 %v979_v56 }
 0x4dc   :  { %v966_v63 = vadd.f32 %v965_v62, %v899_v60  ;;  %v967_v0 = vpop.f32.mrb[39].mxu1  ;;  %995 = vmatpush1.bf16.msra.mxu0 %v978_v54  ;;  %v974_v3 = vmax.f32 %v962_v58, 0.0 }
 0x4dd   :  { %v968_v2 = vadd.f32 %v967_v0, %v899_v60  ;;  %v975_v5 = vmax.f32 %v964_v61, 0.0 }
 0x4de   :  { %v976_v4 = vmax.f32 %v966_v63, 0.0 }
 0x4df   :  { %v977_v6 = vmax.f32 %v968_v2, 0.0 }
 0x4e0   :  { %v980_v7 = vpack.c.bf16 %v976_v4, %v974_v3 }
 0x4e1   :  { %v981_v8 = vpack.c.bf16 %v977_v6, %v975_v5 }
 0x4e3   :  { %996 = vmatprep.subr.bf16.mxu0 %v981_v8 }
 0x4e4   :  { %997 = vmatpush1.bf16.msra.mxu0 %v980_v7 }
 0x4e7   :  { %1099 = vmatmul.mubr.msk.bf16.vlgmr.msra.gmra.mrb[40].mxu0 %vm304_vm2, %v87_v9 }
 0x5ba   :  { %v1028_v18 = vpop.f32.mrb[40].mxu0 }
 0x5bb   :  { %v1029_v19 = vadd.f32 %v1028_v18, %v990_v17  ;;  %v1030_v20 = vpop.f32.mrb[41].mxu0 }
 0x5bc   :  { %v1031_v21 = vadd.f32 %v1030_v20, %v990_v17  ;;  %v1032_v23 = vpop.f32.mrb[42].mxu0 }
 0x5bd   :  { %v1033_v24 = vpop.f32.mrb[43].mxu0 }
 0x5be   :  { %v1037_v25 = vcombine.low %v1029_v19, %v1031_v21 }
 0x5c0   :  { %v1044_v26 = vrot.slane %v1037_v25, %v1043_v22 }
 0x5c2   :  { %v1051_v27 = vrot.slane %v1044_v26, %v1043_v22 }
 0x5c4   :  { %1057 = vst.msk [vmem:[%s1442_s13] sm:$0x3] %vm1055_vm4, %v1051_v27 }

</bundles_post_ra>
